<compile_context>
chip_gen: v7x
topology: tpu7x:2x2x1
jax: 0.10.0
libtpu: 0.0.40
codegen_flags: <defaults>
</compile_context>

<pallas_src>
import functools

import jax
import jax.numpy as jnp
from jax import lax
from jax.experimental import pallas as pl
from jax.experimental.pallas import tpu as pltpu

LANES = 128


def _cdiv(a, b):
    return -(-a // b)


def _round_up(x, m):
    return _cdiv(x, m) * m


def _sublane_multiple(dtype):
    # rows of a block must be a multiple of the dtype's sublane packing:
    # f32 -> 8, bf16 -> 16, int8/bool -> 32.
    return max(8, 32 // jnp.dtype(dtype).itemsize)


def _tpu_config():
    """(max_row_tile, tensorcores_per_chip) for the local device generation."""
    max_row_tile, n_tc = 2048, 1          # v5e / unknown: 1 MiB f32 blocks
    try:
        kind = (jax.devices()[0].device_kind or "").lower()
    except Exception:
        kind = ""
    if "v7" in kind or "7x" in kind:
        max_row_tile, n_tc = 4096, 2      # 2 TCs, compute-bound: big blocks fine
    elif "v6" in kind:
        max_row_tile, n_tc = 4096, 1      # 2 MiB f32 blocks, ~86% of roofline
    return max_row_tile, n_tc


def _input_spec(row_tile, index_map, steps):
    # 3-deep input pipelining hides DMA-issue jitter on long reductions.
    if steps >= 3 and hasattr(pl, "Buffered"):
        try:
            return pl.BlockSpec((row_tile, LANES), index_map,
                                pipeline_mode=pl.Buffered(3))
        except TypeError:
            pass
    return pl.BlockSpec((row_tile, LANES), index_map)


def _focal_loss_kernel(pred_ref, true_ref, out_ref, acc_ref, *,
                       gamma, alpha, n_valid, need_mask, binary_targets):
    c = pl.program_id(0)              # slice axis ("parallel": megacore on v7x)
    i = pl.program_id(1)              # reduction axis ("arbitrary")
    steps = pl.num_programs(1)
    rt, ln = pred_ref.shape

    # static (Python int) validity bounds; all runtime index math is per-row
    # (row indices fit int32 for any realistic N, unlike flat element indices).
    full_rows = n_valid // ln                     # rows that are fully valid
    rem = n_valid % ln                            # valid lanes in the last row
    valid_rows = full_rows + (1 if rem else 0)

    @pl.when(i == 0)
    def _():
        acc_ref[...] = jnp.zeros_like(acc_ref)

    blk = c * steps + i                           # logical block index
    row0 = blk * rt                               # first global row of block

    @pl.when(row0 < valid_rows)                   # skip fully-out-of-range blocks
    def _():
        x = pred_ref[...].astype(jnp.float32)
        y = true_ref[...].astype(jnp.float32)

        if alpha is None and binary_targets:
            # For y in {0,1}:  z = x if y==1 else -x;  BCE = softplus(-z).
            # pt = exp(-BCE) = sigmoid(z), recovered from the same exp via an
            # approx reciprocal (EUP slot otherwise idle) -> one fewer heavy exp.
            z = x * (2.0 * y - 1.0)
            t = jnp.exp(-jnp.abs(z))
            bce = jnp.maximum(-z, 0.0) + jnp.log1p(t)
            r = pl.reciprocal(1.0 + t, approx=True)
            pt = jnp.where(z >= 0.0, r, t * r)
        else:
            # numerically stable BCE-with-logits (exact also for soft targets)
            bce = jnp.maximum(x, 0.0) - x * y + jnp.log1p(jnp.exp(-jnp.abs(x)))
            if alpha is not None:
                a0, a1 = alpha
                # alpha[y.long()] for targets in {0,1} == a0 + (a1-a0)*y (one FMA)
                bce = (jnp.float32(a0) + jnp.float32(a1 - a0) * y) * bce
            pt = jnp.exp(-bce)

        omp = 1.0 - pt
        g = float(gamma)
        if g == 0.0:
            w = jnp.ones_like(omp)
        elif g.is_integer() and 0.0 < g <= 8.0:
            # integer gamma -> repeated multiplies (avoids pow on the EUP)
            w = omp
            for _ in range(int(g) - 1):
                w = w * omp
        else:
            w = omp ** g
        focal = w * bce

        def _accumulate(vals):
            # reduce the block to (8, LANES) with pure vreg adds (no XLU),
            # then accumulate into the tiny resident scratch.
            acc_ref[...] += vals.reshape(rt // 8, 8, ln).sum(axis=0)

        if need_mask:
            tail = (row0 + rt) > full_rows        # block touches invalid data

            @pl.when(tail)
            def _():
                grow = row0 + lax.broadcasted_iota(jnp.int32, (rt, ln), 0)
                lid = lax.broadcasted_iota(jnp.int32, (rt, ln), 1)
                valid = (grow < full_rows) | ((grow == full_rows) & (lid < rem))
                _accumulate(jnp.where(valid, focal, 0.0))

            @pl.when(jnp.logical_not(tail))
            def _():
                _accumulate(focal)
        else:
            _accumulate(focal)

    @pl.when(i == steps - 1)
    def _():
        # lane-dense (1, 8, 128) partial per slice; final tiny reduction is
        # done by XLA in the wrapper.
        out_ref[...] = acc_ref[...][None, :, :]


def focal_loss(y_pred, y_true, *, gamma=2.0, alpha=None, binary_targets=True,
               max_rows_per_block=None):
    """Pallas TPU FocalLoss.forward. Returns a scalar f32.

    alpha: None, a scalar a (-> [a, 1-a]), or a pair (a0, a1).
    binary_targets=True enables the single-exp fast path (targets must be
    exactly {0,1}, which the alpha gather already assumes); pass False for
    soft targets (alpha must then be None to match PyTorch exactly).
    """
    if alpha is not None:
        if isinstance(alpha, (float, int)):
            alpha = (float(alpha), 1.0 - float(alpha))
        else:
            alpha = (float(alpha[0]), float(alpha[1]))

    n = int(y_pred.size)
    assert int(y_true.size) == n and n > 0

    # Stream inputs in their native dtype; the kernel casts to f32 per block.
    pred = jnp.ravel(y_pred)
    true = jnp.ravel(y_true)
    if pred.dtype == jnp.bool_:
        pred = pred.astype(jnp.bfloat16)
    if true.dtype == jnp.bool_:
        true = true.astype(jnp.bfloat16)

    max_row_tile, n_tc = _tpu_config()
    if max_rows_per_block is not None:
        max_row_tile = int(max_rows_per_block)
    sub_mult = max(_sublane_multiple(pred.dtype), _sublane_multiple(true.dtype))

    # minimal padding: only to a multiple of 128 so the flat array can be
    # viewed as (rows, 128); the padded tail is masked in-kernel.
    n128 = _round_up(n, LANES)
    pad = n128 - n
    if pad:
        pred = jnp.pad(pred, (0, pad))
        true = jnp.pad(true, (0, pad))
    rows = n128 // LANES

    row_tile = min(_round_up(max_row_tile, sub_mult), _round_up(rows, sub_mult))
    total_blocks = _cdiv(rows, row_tile)
    # 2-way "parallel" slice axis only where there are 2 TensorCores (v7x).
    n_slices = 2 if (n_tc >= 2 and total_blocks >= 2) else 1
    steps = _cdiv(total_blocks, n_slices)
    last_block = total_blocks - 1

    # mask needed whenever the grid covers any element index >= n
    need_mask = (n_slices * steps * row_tile * LANES) != n

    pred2 = pred.reshape(rows, LANES)
    true2 = true.reshape(rows, LANES)

    def in_index(c, i):
        # clamp phantom trailing blocks to the last real block (their compute
        # is skipped in-kernel via the row0 < valid_rows guard).
        return (jnp.minimum(c * steps + i, last_block), 0)

    in_blk = _input_spec(row_tile, in_index, steps)

    kernel = functools.partial(
        _focal_loss_kernel, gamma=float(gamma), alpha=alpha, n_valid=n,
        need_mask=need_mask, binary_targets=bool(binary_targets))

    n_transc = 2 if (alpha is None and binary_targets) else 3
    cost = pl.CostEstimate(
        flops=15 * n,
        transcendentals=n_transc * n,
        bytes_accessed=int(pred2.size) * pred2.dtype.itemsize
        + int(true2.size) * true2.dtype.itemsize
        + n_slices * 8 * LANES * 4)

    partials = pl.pallas_call(
        kernel,
        out_shape=jax.ShapeDtypeStruct((n_slices, 8, LANES), jnp.float32),
        grid_spec=pltpu.PrefetchScalarGridSpec(
            num_scalar_prefetch=0,
            grid=(n_slices, steps),
            in_specs=[in_blk, in_blk],
            out_specs=pl.BlockSpec((1, 8, LANES), lambda c, i: (c, 0, 0)),
            scratch_shapes=[pltpu.VMEM((8, LANES), jnp.float32)],
        ),
        compiler_params=pltpu.CompilerParams(
            dimension_semantics=("parallel", "arbitrary")),
        cost_estimate=cost,
    )(pred2, true2)

    return jnp.sum(partials) / jnp.float32(n)


def _focal_loss_ref(y_pred, y_true, *, gamma=2.0, alpha=None):
    x = y_pred.astype(jnp.float32).ravel()
    y = y_true.astype(jnp.float32).ravel()
    bce = jnp.maximum(x, 0.0) - x * y + jnp.log1p(jnp.exp(-jnp.abs(x)))
    if alpha is not None:
        if isinstance(alpha, (float, int)):
            alpha = (float(alpha), 1.0 - float(alpha))
        a = jnp.where(y.astype(jnp.int32) == 0, alpha[0], alpha[1])
        bce = a * bce
    pt = jnp.exp(-bce)
    return jnp.mean((1.0 - pt) ** gamma * bce)


def _check(got, want, name):
    # tolerance accommodates the approx-EUP reciprocal used for pt on the
    # alpha=None fast path (rel err ~1e-3 per element, mostly cancelling).
    assert jnp.allclose(got, want, atol=1e-6, rtol=2e-3), (name, got, want)


if __name__ == "__main__":
    key = jax.random.PRNGKey(0)
    k1, k2, k3, k4, k5, k6 = jax.random.split(key, 6)

    # Main case, consistent with the PyTorch module: NCHW logits, {0,1} targets.
    # Targets streamed in bf16 (native narrow dtype, cast in-kernel).
    y_pred = jax.random.normal(k1, (2, 4, 16, 16), dtype=jnp.float32)
    y_true = jax.random.bernoulli(k2, 0.3, (2, 4, 16, 16)).astype(jnp.bfloat16)

    loss = jax.block_until_ready(focal_loss(y_pred, y_true, gamma=2.0, alpha=None))
    _check(loss, _focal_loss_ref(y_pred, y_true, gamma=2.0, alpha=None), "base")

    # alpha branch (scalar alpha -> [alpha, 1-alpha]); exact-exp path.
    loss_a = jax.block_until_ready(focal_loss(y_pred, y_true, gamma=2.0, alpha=0.25))
    _check(loss_a, _focal_loss_ref(y_pred, y_true, gamma=2.0, alpha=0.25), "alpha")

    # Ragged size (f32 targets): exercises the minimal pad + in-kernel tail mask.
    p2 = jax.random.normal(k3, (3, 5, 17, 13), dtype=jnp.float32)
    t2 = jax.random.bernoulli(k4, 0.4, (3, 5, 17, 13)).astype(jnp.float32)
    l2 = jax.block_until_ready(focal_loss(p2, t2, gamma=2.0, alpha=None))
    _check(l2, _focal_loss_ref(p2, t2, gamma=2.0, alpha=None), "ragged")

    # Multi-block case (bf16 logits + bf16 targets): exercises the multi-step
    # reduction, Buffered(3) pipelining, and the 2-slice axis on v7x.
    p3 = jax.random.normal(k5, (4, 4, 64, 128), dtype=jnp.bfloat16)
    t3 = jax.random.bernoulli(k6, 0.2, (4, 4, 64, 128)).astype(jnp.bfloat16)
    l3 = jax.block_until_ready(
        focal_loss(p3, t3, gamma=2.0, alpha=(0.6, 0.4), max_rows_per_block=64))
    _check(l3, _focal_loss_ref(p3, t3, gamma=2.0, alpha=(0.6, 0.4)), "multiblock")

    print("KERNEL_OK")
</pallas_src>

<mosaic_0001>
module attributes {stable_mosaic.version = 11 : i64} {
  func.func @_focal_loss_kernel(%arg0: i32, %arg1: i32, %arg2: memref<16x128xf32, #tpu.memory_space<vmem>>, %arg3: memref<16x128xbf16, #tpu.memory_space<vmem>>, %arg4: memref<1x8x128xf32, #tpu.memory_space<vmem>>, %arg5: memref<8x128xf32, #tpu.memory_space<vmem>>) attributes {dimension_semantics = [#tpu.dimension_semantics<parallel>, #tpu.dimension_semantics<arbitrary>], iteration_bounds = array<i64: 1, 1>, scalar_prefetch = 0 : i64, scratch_operands = 1 : i64, tpu.core_type = #tpu.core_type<tc>, window_params = [{transform_indices = @transform_0, window_bounds = array<i64: 16, 128>}, {transform_indices = @transform_1, window_bounds = array<i64: 16, 128>}, {transform_indices = @transform_2, window_bounds = array<i64: 1, 8, 128>}]} {
    %c0_i32 = arith.constant 0 : i32
    %0 = arith.cmpi eq, %arg1, %c0_i32 : i32
    %1 = arith.extui %0 : i1 to i32
    %c0_i32_0 = arith.constant 0 : i32
    %2 = arith.cmpi ne, %1, %c0_i32_0 : i32
    scf.if %2 {
      %cst = arith.constant 0.000000e+00 : f32
      %12 = vector.broadcast %cst : f32 to vector<8x128xf32>
      %c0 = arith.constant 0 : index
      %c0_5 = arith.constant 0 : index
      %13 = vector.load %arg5[%c0, %c0_5] : memref<8x128xf32, #tpu.memory_space<vmem>>, vector<8x128xf32>
      tpu.vector_store %arg5[%c0, %c0_5], %12 {strides = array<i32>} : memref<8x128xf32, #tpu.memory_space<vmem>>, vector<8x128xf32>,
    } else {
    }
    %c1_i32 = arith.constant 1 : i32
    %3 = arith.muli %arg0, %c1_i32 : i32
    %4 = arith.addi %3, %arg1 : i32
    %c16_i32 = arith.constant 16 : i32
    %5 = arith.muli %4, %c16_i32 : i32
    %c16_i32_1 = arith.constant 16 : i32
    %6 = arith.cmpi slt, %5, %c16_i32_1 : i32
    %7 = arith.extui %6 : i1 to i32
    %c0_i32_2 = arith.constant 0 : i32
    %8 = arith.cmpi ne, %7, %c0_i32_2 : i32
    scf.if %8 {
      %c0 = arith.constant 0 : index
      %c0_5 = arith.constant 0 : index
      %12 = vector.load %arg2[%c0, %c0_5] : memref<16x128xf32, #tpu.memory_space<vmem>>, vector<16x128xf32>
      %c0_6 = arith.constant 0 : index
      %c0_7 = arith.constant 0 : index
      %13 = vector.load %arg3[%c0_6, %c0_7] : memref<16x128xbf16, #tpu.memory_space<vmem>>, vector<16x128xbf16>
      %14 = arith.extf %13 : vector<16x128xbf16> to vector<16x128xf32>
      %cst = arith.constant 2.000000e+00 : f32
      %15 = vector.broadcast %cst : f32 to vector<16x128xf32>
      %16 = arith.mulf %15, %14 : vector<16x128xf32>
      %cst_8 = arith.constant 1.000000e+00 : f32
      %17 = vector.broadcast %cst_8 : f32 to vector<16x128xf32>
      %18 = arith.subf %16, %17 : vector<16x128xf32>
      %19 = arith.mulf %12, %18 : vector<16x128xf32>
      %20 = math.absf %19 : vector<16x128xf32>
      %cst_9 = arith.constant 0.000000e+00 : f32
      %21 = vector.broadcast %cst_9 : f32 to vector<16x128xf32>
      %22 = arith.subf %21, %20 : vector<16x128xf32>
      %23 = math.exp %22 : vector<16x128xf32>
      %cst_10 = arith.constant 0.000000e+00 : f32
      %24 = vector.broadcast %cst_10 : f32 to vector<16x128xf32>
      %25 = arith.subf %24, %19 : vector<16x128xf32>
      %cst_11 = arith.constant 0.000000e+00 : f32
      %26 = vector.broadcast %cst_11 : f32 to vector<16x128xf32>
      %27 = arith.maximumf %25, %26 : vector<16x128xf32>
      %28 = math.log1p %23 : vector<16x128xf32>
      %29 = arith.addf %27, %28 : vector<16x128xf32>
      %cst_12 = arith.constant 1.000000e+00 : f32
      %30 = vector.broadcast %cst_12 : f32 to vector<16x128xf32>
      %31 = arith.addf %30, %23 : vector<16x128xf32>
      %32 = tpu.reciprocal %31 {approx = true} : vector<16x128xf32> -> vector<16x128xf32>
      %cst_13 = arith.constant 0.000000e+00 : f32
      %33 = vector.broadcast %cst_13 : f32 to vector<16x128xf32>
      %34 = arith.cmpf oge, %19, %33 : vector<16x128xf32>
      %35 = arith.mulf %23, %32 : vector<16x128xf32>
      %36 = arith.select %34, %32, %35 : vector<16x128xi1>, vector<16x128xf32>
      %cst_14 = arith.constant 1.000000e+00 : f32
      %37 = vector.broadcast %cst_14 : f32 to vector<16x128xf32>
      %38 = arith.subf %37, %36 : vector<16x128xf32>
      %39 = arith.mulf %38, %38 : vector<16x128xf32>
      %40 = arith.mulf %39, %29 : vector<16x128xf32>
      %c0_15 = arith.constant 0 : index
      %c0_16 = arith.constant 0 : index
      %41 = vector.load %arg5[%c0_15, %c0_16] : memref<8x128xf32, #tpu.memory_space<vmem>>, vector<8x128xf32>
      %42 = vector.shape_cast %40 : vector<16x128xf32> to vector<2x8x128xf32>
      %cst_17 = arith.constant dense<0.000000e+00> : vector<8x128xf32>
      %43 = vector.multi_reduction <add>, %42, %cst_17 [0] : vector<2x8x128xf32> to vector<8x128xf32>
      %44 = arith.addf %41, %43 : vector<8x128xf32>
      %c0_18 = arith.constant 0 : index
      %c0_19 = arith.constant 0 : index
      %45 = vector.load %arg5[%c0_18, %c0_19] : memref<8x128xf32, #tpu.memory_space<vmem>>, vector<8x128xf32>
      tpu.vector_store %arg5[%c0_18, %c0_19], %44 {strides = array<i32>} : memref<8x128xf32, #tpu.memory_space<vmem>>, vector<8x128xf32>,
    } else {
    }
    %c0_i32_3 = arith.constant 0 : i32
    %9 = arith.cmpi eq, %arg1, %c0_i32_3 : i32
    %10 = arith.extui %9 : i1 to i32
    %c0_i32_4 = arith.constant 0 : i32
    %11 = arith.cmpi ne, %10, %c0_i32_4 : i32
    scf.if %11 {
      %c0 = arith.constant 0 : index
      %c0_5 = arith.constant 0 : index
      %12 = vector.load %arg5[%c0, %c0_5] : memref<8x128xf32, #tpu.memory_space<vmem>>, vector<8x128xf32>
      %13 = vector.shape_cast %12 : vector<8x128xf32> to vector<1x8x128xf32>
      %c0_6 = arith.constant 0 : index
      %c0_7 = arith.constant 0 : index
      %c0_8 = arith.constant 0 : index
      %14 = vector.load %arg4[%c0_6, %c0_7, %c0_8] : memref<1x8x128xf32, #tpu.memory_space<vmem>>, vector<1x8x128xf32>
      tpu.vector_store %arg4[%c0_6, %c0_7, %c0_8], %13 {strides = array<i32>} : memref<1x8x128xf32, #tpu.memory_space<vmem>>, vector<1x8x128xf32>,
    } else {
    }
    return
  }
  func.func @transform_0(%arg0: i32, %arg1: i32) -> (i32, i32) {
    %c1_i32 = arith.constant 1 : i32
    %0 = arith.muli %arg0, %c1_i32 : i32
    %1 = arith.addi %0, %arg1 : i32
    %c0_i32 = arith.constant 0 : i32
    %2 = arith.minsi %1, %c0_i32 : i32
    %c0_i32_0 = arith.constant 0 : i32
    %c0_i32_1 = arith.constant 0 : i32
    return %2, %c0_i32_0 : i32, i32
  }
  func.func @transform_1(%arg0: i32, %arg1: i32) -> (i32, i32) {
    %c1_i32 = arith.constant 1 : i32
    %0 = arith.muli %arg0, %c1_i32 : i32
    %1 = arith.addi %0, %arg1 : i32
    %c0_i32 = arith.constant 0 : i32
    %2 = arith.minsi %1, %c0_i32 : i32
    %c0_i32_0 = arith.constant 0 : i32
    %c0_i32_1 = arith.constant 0 : i32
    return %2, %c0_i32_0 : i32, i32
  }
  func.func @transform_2(%arg0: i32, %arg1: i32) -> (i32, i32, i32) {
    %c0_i32 = arith.constant 0 : i32
    %c0_i32_0 = arith.constant 0 : i32
    %c0_i32_1 = arith.constant 0 : i32
    return %arg0, %c0_i32, %c0_i32_0 : i32, i32, i32
  }
}

</mosaic_0001>

<bundles_post_ra>
// kernel: tpu_custom_call.1
= control target key start
LH: loop header
LB: loop body
LE: loop exit
PB: predicated region body
PF: predicated region fallthrough
CT: control target
= control target key end

     0   :  { %7 = vsyncpa [#allocation4], 0  ;;  %s327_s0 = inlined_call_operand.hbm [shape: f32[16,128], index: 0, kind: input, shape index: {}]   ;;  %s328_s1 = inlined_call_operand.hbm [shape: bf16[16,128], index: 1, kind: input, shape index: {}]   ;;  %s329_s2 = inlined_call_operand.hbm [shape: f32[1,8,128], index: 2, kind: output, shape index: {}]  }
   0x1   :  { %8 = vsyncpa [#allocation7], 0 }
   0x2   :  { %9 = vsyncpa [#allocation5], 0  ;;  %s257_s9 = smov [#allocation3]   ;;  %s185_s13 = scalar_lea.hbm %s327_s0, 256 }
   0x3   :  { %s21_s10 = sshll.u32 %s257_s9, 4  ;;  %p186_p0 = scmp.ne.s32.totalorder %s327_s0, %s185_s13  ;;  %s22_s10 = int_to_ptr.vmem [resolvable:$true] %s21_s10 }
   0x4   :  { %p189_p1 = scmp.lt.u32.totalorder %s185_s13, %s327_s0 }
   0x6   :  { %p191_p2 = pnand %p189_p1, %p186_p0 }
   0x8   :  { %194 = shalt.err (!%p191_p2)
}
   0x9   :  { %s195_s18 = scalar_lea.vmem %s22_s10, 256  ;;  %p200_p4 = scmp.lt.s32.totalorder %s22_s10, %s22_s10 }
   0xa   :  { %p196_p3 = scmp.ne.s32.totalorder %s22_s10, %s195_s18  ;;  %p201_p5 = scmp.lt.s32.totalorder %s195_s18, %s195_s18 }
   0xc   :  { %p202_p6 = por %p201_p5, %p200_p4 }
   0xe   :  { %p203_p7 = pnand %p202_p6, %p196_p3 }
  0x10   :  { %206 = shalt.err (!%p203_p7)
}
  0x11   :  { %s258_s19 = smov 128   ;;  %s259_s20 = smov 8  }
  0x12   :  { %27 = dma.hbm_to_vmem [thread:$0]  %s327_s0, 256, %s22_s10, [#allocation4], %s258_s19, %s258_s19, %s259_s20  }
  0x13   :  { %s260_s23 = smov [#allocation6]   ;;  %s207_s27 = scalar_lea.hbm %s328_s1, 128 }
  0x14   :  { %s39_s24 = sshll.u32 %s260_s23, 4  ;;  %p208_p8 = scmp.ne.s32.totalorder %s328_s1, %s207_s27  ;;  %s40_s24 = int_to_ptr.vmem [resolvable:$true] %s39_s24 }
  0x15   :  { %p211_p9 = scmp.lt.u32.totalorder %s207_s27, %s328_s1 }
  0x17   :  { %p213_p10 = pnand %p211_p9, %p208_p8 }
  0x19   :  { %216 = shalt.err (!%p213_p10)
}
  0x1a   :  { %s217_s4 = scalar_lea.vmem %s40_s24, 128  ;;  %p222_p12 = scmp.lt.s32.totalorder %s40_s24, %s40_s24 }
  0x1b   :  { %p218_p11 = scmp.ne.s32.totalorder %s40_s24, %s217_s4  ;;  %p223_p13 = scmp.lt.s32.totalorder %s217_s4, %s217_s4 }
  0x1d   :  { %p224_p0 = por %p223_p13, %p222_p12 }
  0x1f   :  { %p225_p1 = pnand %p224_p0, %p218_p11 }
  0x21   :  { %228 = shalt.err (!%p225_p1)
}
  0x22   :  { %s261_s0 = smov 64   ;;  %s262_s5 = smov 4  }
  0x23   :  { %45 = dma.hbm_to_vmem [thread:$0]  %s328_s1, 128, %s40_s24, [#allocation7], %s261_s0, %s261_s0, %s262_s5  }
  0x24   :  { %251 = dma.done.wait [#allocation4], 256  }
  0x25   :  { %252 = vsyncadd [#allocation4], 4294967040 }
  0x26   :  { %253 = dma.done.wait [#allocation7], 128  }
  0x27   :  { %254 = vsyncadd [#allocation7], 4294967168  ;;  %v163_v0 = vld [vmem:[#allocation6] sm:$0xff]   ;;  %v71_v5 = vld [vmem:[#allocation3] sm:$0xff]  ;;  %s263_s1 = smov [#allocation8]  }
  0x28   :  { %v164_v1 = vunpack.c.l.bf16 %v163_v0  ;;  %v165_v2 = vunpack.c.h.bf16 %v163_v0  ;;  %v72_v6 = vld [vmem:[#allocation3 + $0x8] sm:$0xff]  ;;  %s146_s8 = sshll.u32 %s263_s1, 4  ;;  %s147_s8 = int_to_ptr.vmem [resolvable:$true] %s146_s8 }
  0x29   :  { %s229_s9 = scalar_lea.vmem %s147_s8, 128  ;;  %p234_p3 = scmp.lt.s32.totalorder %s147_s8, %s147_s8 }
  0x2a   :  { %v77_v3 = vmul.f32 2.0, %v164_v1  ;;  %v78_v4 = vmul.f32 2.0, %v165_v2  ;;  %p230_p2 = scmp.ne.s32.totalorder %s147_s8, %s229_s9  ;;  %p235_p4 = scmp.lt.s32.totalorder %s229_s9, %s229_s9 }
  0x2c   :  { %v160_v7 = vadd.f32 -1.0, %v77_v3  ;;  %v161_v8 = vadd.f32 -1.0, %v78_v4  ;;  %p236_p5 = por %p235_p4, %p234_p3 }
  0x2e   :  { %v81_v9 = vmul.f32 %v160_v7, %v71_v5  ;;  %v82_v10 = vmul.f32 %v161_v8, %v72_v6  ;;  %p237_p6 = pnand %p236_p5, %p230_p2 }
  0x30   :  { %v83_v11 = vand.u32 2147483647, %v81_v9  ;;  %v84_v12 = vand.u32 2147483647, %v82_v10  ;;  %v91_v27 = vsub.f32 0.0, %v81_v9  ;;  %v92_v28 = vsub.f32 0.0, %v82_v10 }
  0x31   :  { %vm119_vm2 = vcmp.ge.f32.partialorder %v81_v9, 0.0  ;;  %vm120_vm3 = vcmp.ge.f32.partialorder %v82_v10, 0.0 }
  0x32   :  { %v85_v13 = vsub.f32 0.0, %v83_v11  ;;  %v86_v14 = vsub.f32 0.0, %v84_v12  ;;  %v93_v37 = vmax.f32 %v91_v27, 0.0  ;;  %v94_v40 = vmax.f32 %v92_v28, 0.0 }
  0x34   :  { %v87_v15 = vmul.f32 1.442695, %v85_v13  ;;  %v89_v16 = vmul.f32 1.442695, %v86_v14 }
  0x36   :  { %173 = vpow2.f32 %v87_v15 }
  0x37   :  { %175 = vpow2.f32 %v89_v16 }
  0x40   :  { %v174_v17 = vpop.eup %173 }
  0x41   :  { %v176_v18 = vpop.eup %175  ;;  %v95_v19 = vadd.f32 1.0, %v174_v17  ;;  %v98_v21 = vmul.f32 -0.5, %v174_v17  ;;  %v101_v24 = vand.u32 2147483647, %v174_v17 }
  0x42   :  { %v104_v20 = vadd.f32 1.0, %v176_v18  ;;  %v107_v22 = vmul.f32 -0.5, %v176_v18  ;;  %v110_v26 = vand.u32 2147483647, %v176_v18 }
  0x43   :  { %177 = vlog2.f32 %v95_v19  ;;  %v99_v23 = vadd.f32 1.0, %v98_v21  ;;  %vm303_vm0 = vcmp.lt.f32.partialorder %v101_v24, 0.0004427343 }
  0x44   :  { %179 = vlog2.f32 %v104_v20  ;;  %v108_v25 = vadd.f32 1.0, %v107_v22  ;;  %vm307_vm1 = vcmp.lt.f32.partialorder %v110_v26, 0.0004427343 }
  0x45   :  { %181 = vrcp.f32 %v95_v19  ;;  %v100_v29 = vmul.f32 %v174_v17, %v99_v23 }
  0x46   :  { %183 = vrcp.f32 %v104_v20  ;;  %v109_v32 = vmul.f32 %v176_v18, %v108_v25 }
  0x4d   :  { %v178_v30 = vpop.eup %177 }
  0x4e   :  { %v180_v33 = vpop.eup %179  ;;  %v97_v34 = vmul.f32 0.6931472, %v178_v30 }
  0x4f   :  { %v182_v36 = vpop.eup %181  ;;  %v106_v38 = vmul.f32 0.6931472, %v180_v33 }
  0x50   :  { %v184_v39 = vpop.eup %183  ;;  %v103_v41 = vsel %vm303_vm0, %v100_v29, %v97_v34  ;;  %v121_v42 = vmul.f32 %v182_v36, %v174_v17 }
  0x51   :  { %v112_v43 = vsel %vm307_vm1, %v109_v32, %v106_v38  ;;  %v122_v44 = vmul.f32 %v184_v39, %v176_v18  ;;  %v113_v46 = vadd.f32 %v103_v41, %v93_v37 }
  0x52   :  { %v123_v45 = vsel %vm119_vm2, %v182_v36, %v121_v42  ;;  %v114_v49 = vadd.f32 %v112_v43, %v94_v40 }
  0x53   :  { %v124_v47 = vsel %vm120_vm3, %v184_v39, %v122_v44  ;;  %v125_v48 = vsub.f32 1.0, %v123_v45 }
  0x54   :  { %v126_v50 = vsub.f32 1.0, %v124_v47 }
  0x55   :  { %v127_v51 = vmul.f32 %v125_v48, %v125_v48 }
  0x56   :  { %v128_v52 = vmul.f32 %v126_v50, %v126_v50 }
  0x57   :  { %v129_v53 = vmul.f32 %v127_v51, %v113_v46 }
  0x58   :  { %v130_v54 = vmul.f32 %v128_v52, %v114_v49 }
  0x5a   :  { %v132_v55 = vadd.f32 %v130_v54, %v129_v53 }
  0x5c   :  { %139 = vst [vmem:[#allocation8] sm:$0xff] %v132_v55 }
  0x5d   :  { %240 = shalt.err (!%p237_p6)
}
  0x5e   :  { %s241_s12 = scalar_lea.hbm %s329_s2, 128 }
  0x5f   :  { %p242_p7 = scmp.ne.s32.totalorder %s329_s2, %s241_s12  ;;  %p245_p8 = scmp.lt.u32.totalorder %s241_s12, %s329_s2 }
  0x61   :  { %p247_p9 = pnand %p245_p8, %p242_p7 }
  0x63   :  { %250 = shalt.err (!%p247_p9)
}
  0x64   :  { %149 = dma.vmem_to_hbm [thread:$0]  %s147_s8, 128, %s329_s2, [#allocation5]  }
  0x65   :  { %255 = dma.done.wait [#allocation5], 128  }
  0x66   :  { %256 = vsyncadd [#allocation5], 4294967168 }
  0x67   :  { %153 = vsyncpa [#allocation4], 1 }
  0x68   :  { %154 = vsyncpa [#allocation7], 1 }
  0x69   :  { %155 = vsyncpa [#allocation5], 1 }

</bundles_post_ra>
